<compile_context>
chip_gen: v6e
topology: v6e:2x2x1
jax: 0.10.0
libtpu: 0.0.40
codegen_flags: <defaults>
</compile_context>

<pallas_src>
import functools

import jax
import jax.numpy as jnp
from jax.experimental import pallas as pl
from jax.experimental.pallas import tpu as pltpu


def _masked_linear_kernel(x_ref, w_ref, m_ref, b_ref, y_ref, wm_ref, *,
                          compute_dtype):
    """y_tile = x_tile @ (W * mask) + b, mask applied once at grid step 0."""
    @pl.when(pl.program_id(0) == 0)
    def _():
        # m_ref is (Cin, Cout) or (1, Cout) (variational) and already contains
        # the 1/(1-p) scale; broadcast-multiply once into persistent scratch.
        wm_ref[...] = (w_ref[...] * m_ref[...]).astype(wm_ref.dtype)

    x = x_ref[...]
    if compute_dtype is not None:
        x = x.astype(compute_dtype)
    y = jnp.dot(x, wm_ref[...], preferred_element_type=jnp.float32) + b_ref[...]
    y_ref[...] = y.astype(y_ref.dtype)


def _plain_linear_kernel(x_ref, w_ref, b_ref, y_ref, *, compute_dtype):
    """y_tile = x_tile @ W + b (eval / p == 0 path)."""
    x = x_ref[...]
    w = w_ref[...]
    if compute_dtype is not None:
        x = x.astype(compute_dtype)
        w = w.astype(compute_dtype)
    y = jnp.dot(x, w, preferred_element_type=jnp.float32) + b_ref[...]
    y_ref[...] = y.astype(y_ref.dtype)


def _choose_tm(batch, tm_max):
    """Largest sublane-aligned divisor of `batch` <= tm_max, preferring >= 2 steps."""
    tm = min(tm_max, batch)
    while tm > 8 and (batch % tm or tm % 8):
        tm -= 8
    if batch % tm or tm % 8:
        tm = batch  # fall back to a single full-batch tile
    # keep at least 2 grid steps (x/y double-buffer overlap; v7x megacore) when possible
    while batch // tm < 2 and tm > 8 and (tm // 2) % 8 == 0 and batch % (tm // 2) == 0:
        tm //= 2
    return tm


def weight_drop_linear(x, w, b, *, dropout=0.0, variational=False, training=True,
                       key=None, tm=512, compute_dtype=None):
    """WeightDrop(nn.Linear) forward.

    x: (B, Cin); w: (Cin, Cout) (transposed PyTorch layout); b: (1, Cout);
    key: jax PRNG key for the weight-dropout mask (required when a mask is applied).
    """
    B, Cin = x.shape
    Cin_w, Cout = w.shape
    assert Cin_w == Cin and b.shape == (1, Cout)
    assert 0.0 <= dropout < 1.0, "dropout must be in [0, 1); p==1 is degenerate"
    assert B % 8 == 0, "batch must be sublane-aligned (multiple of 8)"

    # PyTorch semantics: non-variational dropout only when training; variational
    # mode calls F.dropout with training=True unconditionally.
    apply_mask = (dropout > 0.0) and (variational or training)

    tm = _choose_tm(B, tm)
    grid = (B // tm,)
    cd = compute_dtype if compute_dtype is not None else w.dtype

    if apply_mask:
        assert key is not None, "a PRNG key is required when dropout is applied"
        # In the transposed (Cin, Cout) layout, PyTorch's variational per-output-row
        # mask becomes one mask per output column -> (1, Cout).
        mshape = (1, Cout) if variational else (Cin, Cout)
        keep = jax.random.bernoulli(key, p=1.0 - dropout, shape=mshape)
        mask = keep.astype(w.dtype) * jnp.asarray(1.0 / (1.0 - dropout), w.dtype)

    # Honest VMEM budget: double-buffered x/y tiles + resident W/mask/b (+ scratch).
    itemsize = x.dtype.itemsize
    need = (2 * tm * Cin * itemsize + 2 * tm * Cout * itemsize
            + 2 * Cin * Cout * w.dtype.itemsize + 2 * Cout * b.dtype.itemsize)
    if apply_mask:
        need += 2 * mask.size * mask.dtype.itemsize
        need += Cin * Cout * jnp.dtype(cd).itemsize  # persistent masked-W scratch
    vmem_limit = int(min(max(2 * need, 8 * 1024 * 1024), 64 * 1024 * 1024))

    if apply_mask:
        kernel = functools.partial(_masked_linear_kernel, compute_dtype=compute_dtype)
        return pl.pallas_call(
            kernel,
            out_shape=jax.ShapeDtypeStruct((B, Cout), x.dtype),
            grid=grid,
            in_specs=[
                pl.BlockSpec((tm, Cin), lambda i: (i, 0)),     # x: tiled over batch
                pl.BlockSpec((Cin, Cout), lambda i: (0, 0)),   # W: resident in VMEM
                pl.BlockSpec(mshape, lambda i: (0, 0)),        # mask: resident
                pl.BlockSpec((1, Cout), lambda i: (0, 0)),     # b: resident
            ],
            out_specs=pl.BlockSpec((tm, Cout), lambda i: (i, 0)),  # lane-dense output
            scratch_shapes=[pltpu.VMEM((Cin, Cout), cd)],          # masked W, persistent
            compiler_params=pltpu.CompilerParams(
                # "arbitrary": the pid==0 scratch init must see every grid step.
                dimension_semantics=("arbitrary",),
                vmem_limit_bytes=vmem_limit),
        )(x, w, mask, b)

    kernel = functools.partial(_plain_linear_kernel, compute_dtype=compute_dtype)
    return pl.pallas_call(
        kernel,
        out_shape=jax.ShapeDtypeStruct((B, Cout), x.dtype),
        grid=grid,
        in_specs=[
            pl.BlockSpec((tm, Cin), lambda i: (i, 0)),
            pl.BlockSpec((Cin, Cout), lambda i: (0, 0)),
            pl.BlockSpec((1, Cout), lambda i: (0, 0)),
        ],
        out_specs=pl.BlockSpec((tm, Cout), lambda i: (i, 0)),
        compiler_params=pltpu.CompilerParams(
            dimension_semantics=("parallel",),  # no cross-step state on this path
            vmem_limit_bytes=vmem_limit),
    )(x, w, b)


if __name__ == "__main__":
    # Lane-aligned feature dims; batch large enough for a multi-step grid.
    B, CIN, COUT = 512, 128, 128
    DROP = 0.5

    key = jax.random.PRNGKey(0)
    kx, kw, kb, kmask, kmask_v = jax.random.split(key, 5)
    x = jax.random.normal(kx, (B, CIN), dtype=jnp.float32)
    lim = 1.0 / jnp.sqrt(CIN)
    w = jax.random.uniform(kw, (CIN, COUT), jnp.float32, -lim, lim)   # W^T layout
    b = jax.random.uniform(kb, (1, COUT), jnp.float32, -lim, lim)

    ref = x @ w + b

    # 1) p = 0 and eval mode: weight dropout is the identity -> exact Linear.
    y0 = jax.block_until_ready(weight_drop_linear(x, w, b, dropout=0.0, training=True))
    assert y0.shape == (B, COUT)
    assert jnp.allclose(y0, ref, atol=1e-5, rtol=1e-5)

    y_eval = jax.block_until_ready(
        weight_drop_linear(x, w, b, dropout=DROP, training=False))
    assert jnp.allclose(y_eval, ref, atol=1e-5, rtol=1e-5)

    # 2) training, p = 0.5: recover the dropped weight by feeding the identity,
    #    then check the hard dropout invariants (0 or exactly scaled by 1/(1-p)).
    eye = jnp.eye(CIN, dtype=jnp.float32)
    wd = jax.block_until_ready(
        weight_drop_linear(eye, w, b, dropout=DROP, training=True, key=kmask)) - b
    kept = jnp.abs(wd) > 0
    assert jnp.allclose(jnp.where(kept, wd, 0.0),
                        jnp.where(kept, w / (1.0 - DROP), 0.0),
                        atol=1e-5, rtol=1e-5)
    drop_frac = 1.0 - float(jnp.mean(kept.astype(jnp.float32)))
    assert 0.4 < drop_frac < 0.6

    # 3) the dropped-weight forward is consistent with the recovered weights
    #    (same key -> same mask for every grid step / the whole batch).
    y1 = jax.block_until_ready(
        weight_drop_linear(x, w, b, dropout=DROP, training=True, key=kmask))
    assert jnp.all(jnp.isfinite(y1))
    assert jnp.allclose(y1, x @ wd + b, atol=1e-4, rtol=1e-4)

    # 4) variational mode: one shared mask per output unit (column of W^T).
    wdv = jax.block_until_ready(
        weight_drop_linear(eye, w, b, dropout=DROP, variational=True,
                           training=True, key=kmask_v)) - b
    col_kept = jnp.max(jnp.abs(wdv), axis=0) > 0
    assert jnp.allclose(wdv,
                        jnp.where(col_kept[None, :], w / (1.0 - DROP), 0.0),
                        atol=1e-5, rtol=1e-5)
    col_drop_frac = 1.0 - float(jnp.mean(col_kept.astype(jnp.float32)))
    assert 0.2 < col_drop_frac < 0.8

    # 5) bf16 matmul operands (MXU-native on v5e/v6e/v7x), f32 accumulation.
    y_bf16 = jax.block_until_ready(
        weight_drop_linear(x, w, b, dropout=0.0, training=False,
                           compute_dtype=jnp.bfloat16))
    assert jnp.allclose(y_bf16, ref, atol=5e-2, rtol=5e-2)

    print("KERNEL_OK")
</pallas_src>

<mosaic_0001>
module attributes {stable_mosaic.version = 11 : i64} {
  func.func @_plain_linear_kernel(%arg0: i32, %arg1: memref<256x128xf32, #tpu.memory_space<vmem>>, %arg2: memref<128x128xf32, #tpu.memory_space<vmem>>, %arg3: memref<1x128xf32, #tpu.memory_space<vmem>>, %arg4: memref<256x128xf32, #tpu.memory_space<vmem>>) attributes {dimension_semantics = [#tpu.dimension_semantics<parallel>], iteration_bounds = array<i64: 2>, scalar_prefetch = 0 : i64, scratch_operands = 0 : i64, tpu.core_type = #tpu.core_type<tc>, window_params = [{transform_indices = @transform_0, window_bounds = array<i64: 256, 128>}, {pipeline_mode = #tpu.pipeline_mode<synchronous>, transform_indices = @transform_1, window_bounds = array<i64: 128, 128>}, {pipeline_mode = #tpu.pipeline_mode<synchronous>, transform_indices = @transform_2, window_bounds = array<i64: 1, 128>}, {transform_indices = @transform_3, window_bounds = array<i64: 256, 128>}]} {
    %c0 = arith.constant 0 : index
    %c0_0 = arith.constant 0 : index
    %0 = vector.load %arg1[%c0, %c0_0] : memref<256x128xf32, #tpu.memory_space<vmem>>, vector<256x128xf32>
    %c0_1 = arith.constant 0 : index
    %c0_2 = arith.constant 0 : index
    %1 = vector.load %arg2[%c0_1, %c0_2] : memref<128x128xf32, #tpu.memory_space<vmem>>, vector<128x128xf32>
    %cst = arith.constant dense<0.000000e+00> : vector<256x128xf32>
    %2 = tpu.matmul %0, %1, %cst {dimension_numbers = #tpu.dot_dimension_numbers<[1], [0], [0], [1], [0, 0, 1, 1], [], []>} : vector<256x128xf32>, vector<128x128xf32>, vector<256x128xf32> -> vector<256x128xf32>
    %c0_3 = arith.constant 0 : index
    %c0_4 = arith.constant 0 : index
    %3 = vector.load %arg3[%c0_3, %c0_4] : memref<1x128xf32, #tpu.memory_space<vmem>>, vector<1x128xf32>
    %4 = vector.broadcast %3 : vector<1x128xf32> to vector<256x128xf32>
    %5 = arith.addf %2, %4 : vector<256x128xf32>
    %c0_5 = arith.constant 0 : index
    %c0_6 = arith.constant 0 : index
    %6 = vector.load %arg4[%c0_5, %c0_6] : memref<256x128xf32, #tpu.memory_space<vmem>>, vector<256x128xf32>
    tpu.vector_store %arg4[%c0_5, %c0_6], %5 {strides = array<i32>} : memref<256x128xf32, #tpu.memory_space<vmem>>, vector<256x128xf32>,
    return
  }
  func.func @transform_0(%arg0: i32) -> (i32, i32) {
    %c0_i32 = arith.constant 0 : i32
    %c0_i32_0 = arith.constant 0 : i32
    return %arg0, %c0_i32 : i32, i32
  }
  func.func @transform_1(%arg0: i32) -> (i32, i32) {
    %c0_i32 = arith.constant 0 : i32
    %c0_i32_0 = arith.constant 0 : i32
    %c0_i32_1 = arith.constant 0 : i32
    return %c0_i32, %c0_i32_0 : i32, i32
  }
  func.func @transform_2(%arg0: i32) -> (i32, i32) {
    %c0_i32 = arith.constant 0 : i32
    %c0_i32_0 = arith.constant 0 : i32
    %c0_i32_1 = arith.constant 0 : i32
    return %c0_i32, %c0_i32_0 : i32, i32
  }
  func.func @transform_3(%arg0: i32) -> (i32, i32) {
    %c0_i32 = arith.constant 0 : i32
    %c0_i32_0 = arith.constant 0 : i32
    return %arg0, %c0_i32 : i32, i32
  }
}

</mosaic_0001>

<bundles_post_ra>
// kernel: tpu_custom_call.1
= control target key start
LH: loop header
LB: loop body
LE: loop exit
PB: predicated region body
PF: predicated region fallthrough
CT: control target
= control target key end

     0   :  { %8 = vsyncpa [#allocation3], 0  ;;  %s1299_s0 = inlined_call_operand.hbm [shape: f32[512,128], index: 0, kind: input, shape index: {}]   ;;  %s1300_s1 = inlined_call_operand.hbm [shape: f32[128,128], index: 1, kind: input, shape index: {}]   ;;  %s1301_s2 = inlined_call_operand.vmem [shape: f32[1,128], index: 2, kind: input, shape index: {}]   ;;  %s1302_s3 = inlined_call_operand.hbm [shape: f32[512,128], index: 3, kind: output, shape index: {}]  }
   0x1   :  { %10 = vsyncpa [#allocation3 + $0x1], 0 }
   0x2   :  { %11 = vsyncpa [#allocation6], 0 }
   0x3   :  { %12 = vsyncpa [#allocation4], 0 }
   0x4   :  { %14 = vsyncpa [#allocation4 + $0x1], 0  ;;  %s1006_s12 = smov 0   ;;  %s1008_s13 = smov 0  }
   0x5   :  { %s1010_s14 = smov 0   ;;  %s1012_s15 = smov 0  }
   0x6 LB: > { %s1027_s16 = sadd.s32 4294967295, %s977_s15   ;;  %s615_s17 = sadd.s32 4294967294, %s977_s15   ;;  %s977_s15 = sphi %s1012_s15, %s1324_s15   ;;  %s973_s14 = sphi %s1010_s14, %s1323_s14   ;;  %s969_s13 = sphi %s1008_s13, %s1322_s13   ;;  %s965_s12 = sphi %s1006_s12, %s1321_s12  }
   0x7   : > { %p40_p0 = scmp.ne.s32.totalorder %s969_s13, %s965_s12  ;;  %p1303_p1 = scmp.eq.s32.totalorder %s1027_s16, 0 }
   0x8   : > { %p112_p3 = scmp.eq.s32.totalorder %s615_s17, 1  ;;  %p616_p5 = scmp.ge.s32.totalorder %s977_s15, 1 }
   0x9   : > { %p1036_p4 = por %p1303_p1, %p40_p0  ;;  %p119_p7 = scmp.lt.s32.totalorder %s977_s15, 3 }
   0xa   : > { %p1041_p6 = por %p112_p3, %p40_p0  ;;  %s979_s21 = smov [#allocation5]  }
   0xb   : > { %s1307_s18 = scalar_select %p1036_p4, 1, 0 }
   0xc   : > { %s1308_s19 = scalar_select %p1041_p6, 1, 0 }
   0xd   : > { %p1046_p8 = pnand %p616_p5, %p119_p7  ;;  %s131_s22 = sshll.u32 %s979_s21, 4  ;;  %s132_s22 = int_to_ptr.vmem [resolvable:$true] %s131_s22 }
   0xe   : > { %s1060_s24 = sadd.s32 1, %s977_s15   ;;  %s27_s25 = sadd.s32 1, %s973_s14 }
   0xf   : > { %s1309_s20 = scalar_select %p1046_p8, 1, 0 }
  0x10   : > { %p802_p9 = pneg %p1046_p8  ;;  %s24_s26 = ssub.s32 %s977_s15, %s1060_s24 }
  0x11   : > { %s866_s27 = scalar_lea.vmem %s132_s22, 2048  ;;  %p874_p5 = scmp.lt.s32.totalorder %s132_s22, %s132_s22 }
  0x12   : > { %p1055_p11 = pnand %p802_p9, %p1303_p1  ;;  %p867_p13 = scmp.ne.s32.totalorder %s132_s22, %s866_s27 }
  0x13   : > { %p875_p7 = scmp.lt.s32.totalorder %s866_s27, %s866_s27 }
  0x14   : > { %p857_p12 = pneg %p1055_p11 }
  0x15   : > { %p876_p10 = por %p875_p7, %p874_p5 }
  0x16   : > { %p869_p0 = pnand %p867_p13, %p857_p12 }
  0x18   : > { %p870_p3 = pneg %p869_p0 }
  0x1a   : > { %p877_p2 = pnand %p876_p10, %p870_p3 }
  0x1c   : > { %880 = shalt.err (!%p877_p2)
}
  0x1d   : > { %s980_s28 = smov 128   ;;  %s981_s29 = smov 8  }
  0x1e   : > { %805 = dma.hbm_to_vmem [thread:$0]  (!%p1055_p11), %s1300_s1, 2048, %s132_s22, [#allocation6], %s980_s28, %s980_s28, %s981_s29  }
  0x1f   : > { %p25_p2 = scmp.eq.s32.totalorder %s24_s26, 0  ;;  %p34_p9 = scmp.ne.s32.totalorder %s973_s14, %s969_s13 }
  0x20   : > { %p35_p10 = scmp.eq.s32.totalorder %s977_s15, 0  ;;  %p815_p12 = scmp.lt.s32.totalorder %s977_s15, 2 }
  0x21   : > { %s1080_s5 = scalar_select %p25_p2, %s973_s14, %s27_s25  }
  0x22   : > { %p36_p13 = por %p35_p10, %p34_p9  ;;  %p1311_p0 = scmp.eq.s32.totalorder %s1027_s16, 1 }
  0x23   : > { %s148_s7 = sand.u32 1, %s973_s14   ;;  %s632_s8 = sshll.u32 %s977_s15, 12 }
  0x24   : > { %p1084_p3 = por %p1311_p0, %p34_p9  ;;  %s619_s9 = sshll.u32 %s148_s7, 8 }
  0x25   : > { %s1093_s17 = scalar_lea.hbm %s1299_s0, %s632_s8  ;;  %s152_s21 = scalar_lea.vmem [#allocation2], %s619_s9 }
  0x26   : > { %s1312_s6 = scalar_select %p1084_p3, 1, 0 }
  0x27   : > { %s159_s22 = sshll.u32 %s152_s21, 4  ;;  %p1095_p11 = pnand %p815_p12, %p36_p13  ;;  %s1099_s22 = int_to_ptr.vmem [resolvable:$true] %s159_s22 }
  0x28   : > { %s1101_s25 = scalar_lea.sflag [#allocation3], %s148_s7  ;;  %s881_s26 = scalar_lea.hbm %s1093_s17, 4096 }
  0x29   : > { %p882_p5 = scmp.ne.s32.totalorder %s1093_s17, %s881_s26  ;;  %p883_p7 = pneg %p1095_p11 }
  0x2a   : > { %s886_s4 = scalar_lea.hbm %s1299_s0, 8192  ;;  %p887_p10 = scmp.lt.s32.totalorder %s1093_s17, %s1299_s0 }
  0x2b   : > { %p884_p2 = pnand %p883_p7, %p882_p5  ;;  %p888_p12 = scmp.lt.s32.totalorder %s886_s4, %s881_s26 }
  0x2d   : > { %p885_p9 = pneg %p884_p2  ;;  %p889_p13 = por %p888_p12, %p887_p10 }
  0x2f   : > { %p890_p0 = pnand %p889_p13, %p885_p9 }
  0x31   : > { %893 = shalt.err (!%p890_p0)
}
  0x32   : > { %s894_s7 = scalar_lea.vmem %s1099_s22, 4096  ;;  %s982_s10 = smov [#allocation2]  }
  0x33   : > { %p895_p1 = scmp.ne.s32.totalorder %s1099_s22, %s894_s7  ;;  %s899_s11 = sshll.u32 %s982_s10, 4  ;;  %s900_s11 = int_to_ptr.vmem [resolvable:$false] %s899_s11 }
  0x34   : > { %s901_s21 = scalar_lea.vmem %s900_s11, 8192  ;;  %p902_p2 = scmp.lt.s32.totalorder %s1099_s22, %s900_s11 }
  0x35   : > { %p897_p6 = pnand %p895_p1, %p883_p7  ;;  %p903_p3 = scmp.lt.s32.totalorder %s901_s21, %s894_s7 }
  0x37   : > { %p898_p5 = pneg %p897_p6  ;;  %p904_p4 = por %p903_p3, %p902_p2 }
  0x39   : > { %p905_p8 = pnand %p904_p4, %p898_p5 }
  0x3b   : > { %908 = shalt.err (!%p905_p8)
}
  0x3c   : > { %809 = dma.hbm_to_vmem [thread:$0]  (!%p1095_p11), %s1093_s17, 4096, %s1099_s22, %s1101_s25, %s980_s28, %s980_s28, %s981_s29  }
  0x3d   : > { %p1314_p1 = scmp.ne.s32.totalorder %s1309_s20, 0 }
  0x3e   : > { %s1128_s26 = sand.u32 (!%p1314_p1), 1, %s969_s13   ;;  %p1315_p4 = scmp.ne.s32.totalorder (!%p1314_p1), %s1307_s18, 0 }
  0x3f   : > { %171 = sbr.rel (%p1314_p1) target bundleno = 345 (0x159), region = 32  ;;  %s623_s27 = sshll.u32 (!%p1314_p1), %s1128_s26, 8 }
  0x40   : > { %s174_s30 = scalar_lea.sflag (!%p1314_p1), [#allocation3], %s1128_s26  ;;  %s1134_s23 = scalar_lea.vmem (!%p1314_p1), [#allocation2], %s623_s27 }
  0x44   : > { %952 = dma.done.wait (%p1315_p4), %s174_s30, 4096  }
  0x45   : > { %954 = vsyncadd (%p1315_p4), %s174_s30, 4294963200  ;;  %p1316_p6 = scmp.eq.s32.totalorder %s1027_s16, 0 }
  0x47   : > { %956 = dma.done.wait (%p1316_p6), [#allocation6], 2048   ;;  %p1317_p8 = pmov %p1316_p6 }
  0x48   : > { %v253_v0 = vld [vmem:[#allocation5 + $0x78] sm:$0xff]  ;;  %v252_v1 = vld [vmem:[#allocation5 + $0x70] sm:$0xff]  ;;  %v251_v2 = vld [vmem:[#allocation5 + $0x68] sm:$0xff]  ;;  %s1185_s28 = scalar_lea.vmem [#allocation7], %s623_s27  ;;  %s633_s29 = sshll.u32 %s1027_s16, 12 }
  0x49   : > { %958 = vsyncadd (%p1317_p8), [#allocation6], 4294965248  ;;  %682 = vmatprep.subr.mxu0 %v253_v0  ;;  %762 = vmatprep.subr.mxu1 %v253_v0  ;;  %v250_v3 = vld [vmem:[#allocation5 + $0x60] sm:$0xff]  ;;  %v249_v4 = vld [vmem:[#allocation5 + $0x58] sm:$0xff]  ;;  %s532_s17 = sshll.u32 %s1185_s28, 4  ;;  %s1248_s4 = scalar_lea.hbm %s1302_s3, %s633_s29  ;;  %s1250_s17 = int_to_ptr.vmem [resolvable:$true] %s532_s17 }
  0x4a   : > { %683 = vmatpush3.msra.mxu0 %v253_v0  ;;  %778 = vmatpush3.msra.mxu1 %v253_v0  ;;  %v248_v5 = vld [vmem:[#allocation5 + $0x50] sm:$0xff]  ;;  %v247_v6 = vld [vmem:[#allocation5 + $0x48] sm:$0xff]  ;;  %v246_v7 = vld [vmem:[#allocation5 + $0x40] sm:$0xff]  ;;  %s519_s16 = scalar_lea.sflag [#allocation4], %s1128_s26  ;;  %s909_s8 = scalar_lea.vmem %s1250_s17, 4096 }
  0x4b   : > { %684 = vmatprep.subr.mxu0 %v252_v1  ;;  %763 = vmatprep.subr.mxu1 %v252_v1  ;;  %v245_v8 = vld [vmem:[#allocation5 + $0x38] sm:$0xff]  ;;  %v244_v9 = vld [vmem:[#allocation5 + $0x30] sm:$0xff]  ;;  %v243_v10 = vld [vmem:[#allocation5 + $0x28] sm:$0xff]  ;;  %p910_p3 = scmp.ne.s32.totalorder %s1250_s17, %s909_s8  ;;  %p1318_p11 = scmp.ne.s32.totalorder %s1312_s6, 0 }
  0x4c   : > { %685 = vmatpush3.msra.mxu0 %v252_v1  ;;  %779 = vmatpush3.msra.mxu1 %v252_v1  ;;  %v242_v11 = vld [vmem:[#allocation5 + $0x20] sm:$0xff]  ;;  %v241_v12 = vld [vmem:[#allocation5 + $0x18] sm:$0xff]  ;;  %v240_v13 = vld [vmem:[#allocation5 + $0x10] sm:$0xff]  ;;  %s983_s9 = smov [#allocation7]  }
  0x4d   : > { %686 = vmatprep.subr.mxu0 %v251_v2  ;;  %764 = vmatprep.subr.mxu1 %v251_v2  ;;  %v239_v14 = vld [vmem:[#allocation5 + $0x8] sm:$0xff]  ;;  %v238_v15 = vld [vmem:[#allocation5] sm:$0xff]  ;;  %v208_v20 = vld [vmem:[%s1134_s23 + $0x10] sm:$0xff]  ;;  %p911_p7 = pnand %p910_p3, %p1318_p11  ;;  %s913_s7 = sshll.u32 %s983_s9, 4  ;;  %s914_s7 = int_to_ptr.vmem [resolvable:$false] %s913_s7 }
  0x4e   : > { %687 = vmatpush3.msra.mxu0 %v251_v2  ;;  %780 = vmatpush3.msra.mxu1 %v251_v2  ;;  %v206_v16 = vld [vmem:[%s1134_s23] sm:$0xff]  ;;  %v207_v18 = vld [vmem:[%s1134_s23 + $0x8] sm:$0xff]  ;;  %v224_v21 = vld [vmem:[%s1134_s23 + $0x90] sm:$0xff]  ;;  %s915_s10 = scalar_lea.vmem %s914_s7, 8192  ;;  %p916_p10 = scmp.lt.s32.totalorder %s1250_s17, %s914_s7 }
  0x4f   : > { %688 = vmatprep.subr.mxu0 %v250_v3  ;;  %765 = vmatprep.subr.mxu1 %v250_v3  ;;  %v222_v17 = vld [vmem:[%s1134_s23 + $0x80] sm:$0xff]  ;;  %v223_v19 = vld [vmem:[%s1134_s23 + $0x88] sm:$0xff]  ;;  %v209_v22 = vld [vmem:[%s1134_s23 + $0x18] sm:$0xff]  ;;  %p912_p9 = pneg %p911_p7  ;;  %p917_p12 = scmp.lt.s32.totalorder %s915_s10, %s909_s8 }
  0x50   : > { %689 = vmatpush3.msra.mxu0 %v250_v3  ;;  %781 = vmatpush3.msra.mxu1 %v250_v3  ;;  %v225_v23 = vld [vmem:[%s1134_s23 + $0x98] sm:$0xff]  ;;  %v210_v24 = vld [vmem:[%s1134_s23 + $0x20] sm:$0xff]  ;;  %v211_v26 = vld [vmem:[%s1134_s23 + $0x28] sm:$0xff] }
  0x51   : > { %690 = vmatprep.subr.mxu0 %v249_v4  ;;  %766 = vmatprep.subr.mxu1 %v249_v4  ;;  %v226_v25 = vld [vmem:[%s1134_s23 + $0xa0] sm:$0xff]  ;;  %v227_v27 = vld [vmem:[%s1134_s23 + $0xa8] sm:$0xff]  ;;  %v212_v28 = vld [vmem:[%s1134_s23 + $0x30] sm:$0xff]  ;;  %p918_p13 = por %p917_p12, %p916_p10 }
  0x52   : > { %691 = vmatpush3.msra.mxu0 %v249_v4  ;;  %782 = vmatpush3.msra.mxu1 %v249_v4  ;;  %v228_v29 = vld [vmem:[%s1134_s23 + $0xb0] sm:$0xff]  ;;  %v213_v30 = vld [vmem:[%s1134_s23 + $0x38] sm:$0xff]  ;;  %v214_v32 = vld [vmem:[%s1134_s23 + $0x40] sm:$0xff] }
  0x53   : > { %692 = vmatprep.subr.mxu0 %v248_v5  ;;  %767 = vmatprep.subr.mxu1 %v248_v5  ;;  %v229_v31 = vld [vmem:[%s1134_s23 + $0xb8] sm:$0xff]  ;;  %v230_v33 = vld [vmem:[%s1134_s23 + $0xc0] sm:$0xff]  ;;  %v215_v34 = vld [vmem:[%s1134_s23 + $0x48] sm:$0xff]  ;;  %p919_p0 = pnand %p918_p13, %p912_p9 }
  0x54   : > { %693 = vmatpush3.msra.mxu0 %v248_v5  ;;  %783 = vmatpush3.msra.mxu1 %v248_v5  ;;  %v231_v35 = vld [vmem:[%s1134_s23 + $0xc8] sm:$0xff]  ;;  %v216_v36 = vld [vmem:[%s1134_s23 + $0x50] sm:$0xff]  ;;  %v217_v38 = vld [vmem:[%s1134_s23 + $0x58] sm:$0xff] }
  0x55   : > { %694 = vmatprep.subr.mxu0 %v247_v6  ;;  %768 = vmatprep.subr.mxu1 %v247_v6  ;;  %v232_v37 = vld [vmem:[%s1134_s23 + $0xd0] sm:$0xff]  ;;  %v233_v39 = vld [vmem:[%s1134_s23 + $0xd8] sm:$0xff]  ;;  %v218_v40 = vld [vmem:[%s1134_s23 + $0x60] sm:$0xff] }
  0x56   : > { %695 = vmatpush3.msra.mxu0 %v247_v6  ;;  %784 = vmatpush3.msra.mxu1 %v247_v6  ;;  %v234_v41 = vld [vmem:[%s1134_s23 + $0xe0] sm:$0xff]  ;;  %v219_v42 = vld [vmem:[%s1134_s23 + $0x68] sm:$0xff]  ;;  %v220_v44 = vld [vmem:[%s1134_s23 + $0x70] sm:$0xff] }
  0x57   : > { %696 = vmatprep.subr.mxu0 %v246_v7  ;;  %769 = vmatprep.subr.mxu1 %v246_v7  ;;  %v235_v43 = vld [vmem:[%s1134_s23 + $0xe8] sm:$0xff]  ;;  %v236_v45 = vld [vmem:[%s1134_s23 + $0xf0] sm:$0xff]  ;;  %v221_v46 = vld [vmem:[%s1134_s23 + $0x78] sm:$0xff] }
  0x58   : > { %697 = vmatpush3.msra.mxu0 %v246_v7  ;;  %785 = vmatpush3.msra.mxu1 %v246_v7  ;;  %v237_v47 = vld [vmem:[%s1134_s23 + $0xf8] sm:$0xff]  ;;  %v1179_v48 = vld [vmem:[%s1301_s2] ss:$0 sm:$0xff] }
  0x59   : > { %698 = vmatprep.subr.mxu0 %v245_v8  ;;  %770 = vmatprep.subr.mxu1 %v245_v8 }
  0x5a   : > { %699 = vmatpush3.msra.mxu0 %v245_v8  ;;  %786 = vmatpush3.msra.mxu1 %v245_v8 }
  0x5b   : > { %700 = vmatprep.subr.mxu0 %v244_v9  ;;  %771 = vmatprep.subr.mxu1 %v244_v9 }
  0x5c   : > { %701 = vmatpush3.msra.mxu0 %v244_v9  ;;  %787 = vmatpush3.msra.mxu1 %v244_v9 }
  0x5d   : > { %702 = vmatprep.subr.mxu0 %v243_v10  ;;  %772 = vmatprep.subr.mxu1 %v243_v10 }
  0x5e   : > { %703 = vmatpush3.msra.mxu0 %v243_v10  ;;  %788 = vmatpush3.msra.mxu1 %v243_v10 }
  0x5f   : > { %704 = vmatprep.subr.mxu0 %v242_v11  ;;  %773 = vmatprep.subr.mxu1 %v242_v11 }
  0x60   : > { %705 = vmatpush3.msra.mxu0 %v242_v11  ;;  %789 = vmatpush3.msra.mxu1 %v242_v11 }
  0x61   : > { %706 = vmatprep.subr.mxu0 %v241_v12  ;;  %774 = vmatprep.subr.mxu1 %v241_v12 }
  0x62   : > { %707 = vmatpush3.msra.mxu0 %v241_v12  ;;  %790 = vmatpush3.msra.mxu1 %v241_v12 }
  0x63   : > { %708 = vmatprep.subr.mxu0 %v240_v13  ;;  %775 = vmatprep.subr.mxu1 %v240_v13 }
  0x64   : > { %709 = vmatpush3.msra.mxu0 %v240_v13  ;;  %791 = vmatpush3.msra.mxu1 %v240_v13 }
  0x65   : > { %710 = vmatprep.subr.mxu0 %v239_v14  ;;  %776 = vmatprep.subr.mxu1 %v239_v14 }
  0x66   : > { %711 = vmatpush3.msra.mxu0 %v239_v14  ;;  %792 = vmatpush3.msra.mxu1 %v239_v14 }
  0x67   : > { %712 = vmatprep.subr.mxu0 %v238_v15  ;;  %777 = vmatprep.subr.mxu1 %v238_v15 }
  0x68   : > { %713 = vmatpush3.msra.mxu0 %v238_v15  ;;  %793 = vmatpush3.msra.mxu1 %v238_v15 }
  0x69   : > { %714 = vmatprep.mubr.f32.mxu0 %v206_v16  ;;  %738 = vmatprep.mubr.f32.mxu1 %v222_v17 }
  0x6a   : > { %715 = vmatmul.mubr.f32.vlgmr.msra.gmra.mxu0 %v207_v18  ;;  %739 = vmatmul.mubr.f32.vlgmr.msra.gmra.mxu1 %v223_v19 }
  0x6b   : > { %717 = vmatprep.mubr.f32.mxu0 %v208_v20  ;;  %741 = vmatprep.mubr.f32.mxu1 %v224_v21 }
  0x6e   : > { %718 = vmatmul.mubr.f32.gmra.mxu0 %v209_v22  ;;  %742 = vmatmul.mubr.f32.gmra.mxu1 %v225_v23 }
  0x6f   : > { %720 = vmatprep.mubr.f32.mxu0 %v210_v24  ;;  %744 = vmatprep.mubr.f32.mxu1 %v226_v25 }
  0x72   : > { %721 = vmatmul.mubr.f32.gmra.mxu0 %v211_v26  ;;  %745 = vmatmul.mubr.f32.gmra.mxu1 %v227_v27 }
  0x73   : > { %723 = vmatprep.mubr.f32.mxu0 %v212_v28  ;;  %747 = vmatprep.mubr.f32.mxu1 %v228_v29 }
  0x76   : > { %724 = vmatmul.mubr.f32.gmra.mxu0 %v213_v30  ;;  %748 = vmatmul.mubr.f32.gmra.mxu1 %v229_v31 }
  0x77   : > { %726 = vmatprep.mubr.f32.mxu0 %v214_v32  ;;  %750 = vmatprep.mubr.f32.mxu1 %v230_v33 }
  0x7a   : > { %727 = vmatmul.mubr.f32.gmra.mxu0 %v215_v34  ;;  %751 = vmatmul.mubr.f32.gmra.mxu1 %v231_v35 }
  0x7b   : > { %729 = vmatprep.mubr.f32.mxu0 %v216_v36  ;;  %753 = vmatprep.mubr.f32.mxu1 %v232_v37 }
  0x7e   : > { %730 = vmatmul.mubr.f32.gmra.mxu0 %v217_v38  ;;  %754 = vmatmul.mubr.f32.gmra.mxu1 %v233_v39 }
  0x7f   : > { %732 = vmatprep.mubr.f32.mxu0 %v218_v40  ;;  %756 = vmatprep.mubr.f32.mxu1 %v234_v41 }
  0x82   : > { %733 = vmatmul.mubr.f32.gmra.mxu0 %v219_v42  ;;  %757 = vmatmul.mubr.f32.gmra.mxu1 %v235_v43 }
  0x83   : > { %735 = vmatprep.mubr.f32.mxu0 %v220_v44  ;;  %759 = vmatprep.mubr.f32.mxu1 %v236_v45 }
  0x86   : > { %736 = vmatmul.mubr.f32.gmra.mxu0 %v221_v46  ;;  %760 = vmatmul.mubr.f32.gmra.mxu1 %v237_v47 }
 0x12a   : > { %v716_v49 = vpop.f32.mrf.mxu0  ;;  %v740_v50 = vpop.f32.mrf.mxu1 }
 0x12b   : > { %v333_v51 = vadd.f32 %v716_v49, %v1179_v48  ;;  %v413_v52 = vadd.f32 %v740_v50, %v1179_v48 }
 0x12c   : > { %v327_v53 = vpop.f32.mrf.mxu0  ;;  %v407_v54 = vpop.f32.mrf.mxu1 }
 0x12d   : > { %487 = vst [vmem:[%s1185_s28 + $0x8] sm:$0xff] %v333_v51  ;;  %503 = vst [vmem:[%s1185_s28 + $0x88] sm:$0xff] %v413_v52  ;;  %v328_v55 = vadd.f32 %v1179_v48, %v327_v53  ;;  %v408_v56 = vadd.f32 %v1179_v48, %v407_v54 }
 0x12e   : > { %v719_v57 = vpop.f32.mrf.mxu0  ;;  %v743_v58 = vpop.f32.mrf.mxu1 }
 0x12f   : > { %486 = vst [vmem:[%s1185_s28] sm:$0xff] %v328_v55  ;;  %502 = vst [vmem:[%s1185_s28 + $0x80] sm:$0xff] %v408_v56  ;;  %v343_v59 = vadd.f32 %v719_v57, %v1179_v48  ;;  %v423_v60 = vadd.f32 %v743_v58, %v1179_v48 }
 0x130   : > { %v337_v61 = vpop.f32.mrf.mxu0  ;;  %v417_v62 = vpop.f32.mrf.mxu1 }
 0x131   : > { %489 = vst [vmem:[%s1185_s28 + $0x18] sm:$0xff] %v343_v59  ;;  %505 = vst [vmem:[%s1185_s28 + $0x98] sm:$0xff] %v423_v60  ;;  %v338_v63 = vadd.f32 %v1179_v48, %v337_v61  ;;  %v418_v0 = vadd.f32 %v1179_v48, %v417_v62 }
 0x132   : > { %v722_v1 = vpop.f32.mrf.mxu0  ;;  %v746_v2 = vpop.f32.mrf.mxu1 }
 0x133   : > { %488 = vst [vmem:[%s1185_s28 + $0x10] sm:$0xff] %v338_v63  ;;  %504 = vst [vmem:[%s1185_s28 + $0x90] sm:$0xff] %v418_v0  ;;  %v353_v3 = vadd.f32 %v722_v1, %v1179_v48  ;;  %v433_v4 = vadd.f32 %v746_v2, %v1179_v48 }
 0x134   : > { %v347_v5 = vpop.f32.mrf.mxu0  ;;  %v427_v6 = vpop.f32.mrf.mxu1 }
 0x135   : > { %491 = vst [vmem:[%s1185_s28 + $0x28] sm:$0xff] %v353_v3  ;;  %507 = vst [vmem:[%s1185_s28 + $0xa8] sm:$0xff] %v433_v4  ;;  %v348_v7 = vadd.f32 %v1179_v48, %v347_v5  ;;  %v428_v8 = vadd.f32 %v1179_v48, %v427_v6 }
 0x136   : > { %v725_v9 = vpop.f32.mrf.mxu0  ;;  %v749_v10 = vpop.f32.mrf.mxu1 }
 0x137   : > { %490 = vst [vmem:[%s1185_s28 + $0x20] sm:$0xff] %v348_v7  ;;  %506 = vst [vmem:[%s1185_s28 + $0xa0] sm:$0xff] %v428_v8  ;;  %v363_v11 = vadd.f32 %v725_v9, %v1179_v48  ;;  %v443_v12 = vadd.f32 %v749_v10, %v1179_v48 }
 0x138   : > { %v357_v13 = vpop.f32.mrf.mxu0  ;;  %v437_v14 = vpop.f32.mrf.mxu1 }
 0x139   : > { %493 = vst [vmem:[%s1185_s28 + $0x38] sm:$0xff] %v363_v11  ;;  %509 = vst [vmem:[%s1185_s28 + $0xb8] sm:$0xff] %v443_v12  ;;  %v358_v15 = vadd.f32 %v1179_v48, %v357_v13  ;;  %v438_v16 = vadd.f32 %v1179_v48, %v437_v14 }
 0x13a   : > { %v728_v17 = vpop.f32.mrf.mxu0  ;;  %v752_v18 = vpop.f32.mrf.mxu1 }
 0x13b   : > { %492 = vst [vmem:[%s1185_s28 + $0x30] sm:$0xff] %v358_v15  ;;  %508 = vst [vmem:[%s1185_s28 + $0xb0] sm:$0xff] %v438_v16  ;;  %v373_v19 = vadd.f32 %v728_v17, %v1179_v48  ;;  %v453_v20 = vadd.f32 %v752_v18, %v1179_v48 }
 0x13c   : > { %v367_v21 = vpop.f32.mrf.mxu0  ;;  %v447_v22 = vpop.f32.mrf.mxu1 }
 0x13d   : > { %495 = vst [vmem:[%s1185_s28 + $0x48] sm:$0xff] %v373_v19  ;;  %511 = vst [vmem:[%s1185_s28 + $0xc8] sm:$0xff] %v453_v20  ;;  %v368_v23 = vadd.f32 %v1179_v48, %v367_v21  ;;  %v448_v24 = vadd.f32 %v1179_v48, %v447_v22 }
 0x13e   : > { %v731_v25 = vpop.f32.mrf.mxu0  ;;  %v755_v26 = vpop.f32.mrf.mxu1 }
 0x13f   : > { %494 = vst [vmem:[%s1185_s28 + $0x40] sm:$0xff] %v368_v23  ;;  %510 = vst [vmem:[%s1185_s28 + $0xc0] sm:$0xff] %v448_v24  ;;  %v383_v27 = vadd.f32 %v731_v25, %v1179_v48  ;;  %v463_v28 = vadd.f32 %v755_v26, %v1179_v48 }
 0x140   : > { %v377_v29 = vpop.f32.mrf.mxu0  ;;  %v457_v30 = vpop.f32.mrf.mxu1 }
 0x141   : > { %497 = vst [vmem:[%s1185_s28 + $0x58] sm:$0xff] %v383_v27  ;;  %513 = vst [vmem:[%s1185_s28 + $0xd8] sm:$0xff] %v463_v28  ;;  %v378_v31 = vadd.f32 %v1179_v48, %v377_v29  ;;  %v458_v32 = vadd.f32 %v1179_v48, %v457_v30 }
 0x142   : > { %v734_v33 = vpop.f32.mrf.mxu0  ;;  %v758_v34 = vpop.f32.mrf.mxu1 }
 0x143   : > { %496 = vst [vmem:[%s1185_s28 + $0x50] sm:$0xff] %v378_v31  ;;  %512 = vst [vmem:[%s1185_s28 + $0xd0] sm:$0xff] %v458_v32  ;;  %v393_v35 = vadd.f32 %v734_v33, %v1179_v48  ;;  %v473_v36 = vadd.f32 %v758_v34, %v1179_v48 }
 0x144   : > { %v387_v37 = vpop.f32.mrf.mxu0  ;;  %v467_v38 = vpop.f32.mrf.mxu1 }
 0x145   : > { %499 = vst [vmem:[%s1185_s28 + $0x68] sm:$0xff] %v393_v35  ;;  %515 = vst [vmem:[%s1185_s28 + $0xe8] sm:$0xff] %v473_v36  ;;  %v388_v39 = vadd.f32 %v1179_v48, %v387_v37  ;;  %v468_v40 = vadd.f32 %v1179_v48, %v467_v38 }
 0x146   : > { %v737_v41 = vpop.f32.mrf.mxu0  ;;  %v761_v42 = vpop.f32.mrf.mxu1 }
 0x147   : > { %498 = vst [vmem:[%s1185_s28 + $0x60] sm:$0xff] %v388_v39  ;;  %514 = vst [vmem:[%s1185_s28 + $0xe0] sm:$0xff] %v468_v40  ;;  %v403_v43 = vadd.f32 %v737_v41, %v1179_v48  ;;  %v483_v44 = vadd.f32 %v761_v42, %v1179_v48 }
 0x148   : > { %v397_v45 = vpop.f32.mrf.mxu0  ;;  %v477_v46 = vpop.f32.mrf.mxu1 }
 0x149   : > { %501 = vst [vmem:[%s1185_s28 + $0x78] sm:$0xff] %v403_v43  ;;  %517 = vst [vmem:[%s1185_s28 + $0xf8] sm:$0xff] %v483_v44  ;;  %v398_v47 = vadd.f32 %v1179_v48, %v397_v45  ;;  %v478_v49 = vadd.f32 %v1179_v48, %v477_v46 }
 0x14b   : > { %500 = vst [vmem:[%s1185_s28 + $0x70] sm:$0xff] %v398_v47  ;;  %516 = vst [vmem:[%s1185_s28 + $0xf0] sm:$0xff] %v478_v49 }
 0x14c   : > { %922 = shalt.err (!%p919_p0)
}
 0x14d   : > { %s923_s11 = scalar_lea.hbm %s1248_s4, 4096  ;;  %s927_s30 = scalar_lea.hbm %s1302_s3, 8192 }
 0x14e   : > { %p924_p5 = scmp.ne.s32.totalorder %s1248_s4, %s923_s11  ;;  %p928_p4 = scmp.lt.s32.totalorder %s1248_s4, %s1302_s3 }
 0x14f   : > { %p929_p6 = scmp.lt.s32.totalorder %s927_s30, %s923_s11 }
 0x150   : > { %p925_p2 = pnand %p924_p5, %p1318_p11 }
 0x151   : > { %p930_p8 = por %p929_p6, %p928_p4 }
 0x152   : > { %p926_p1 = pneg %p925_p2 }
 0x154   : > { %p931_p3 = pnand %p930_p8, %p926_p1 }
 0x156   : > { %934 = shalt.err (!%p931_p3)
}
 0x157   : > { %s984_s20 = smov 128   ;;  %s985_s28 = smov 8  }
 0x158   : > { %800 = dma.vmem_to_hbm [thread:$0]  (%p1318_p11), %s1250_s17, 4096, %s1248_s4, %s519_s16, %s984_s20, %s984_s20, %s985_s28  }
 0x159 PF: > { %s547_s29 = sand.u32 1, %s965_s12   ;;  %p1319_p7 = scmp.ne.s32.totalorder %s1308_s19, 0 }
 0x15a   : > { %p1320_p9 = scmp.ge.s32.totalorder %s977_s15, 2  ;;  %s548_s22 = scalar_lea.sflag [#allocation4], %s547_s29 }
 0x15c   : > { %p811_p10 = pnand %p1320_p9, %p1319_p7 }
 0x15e   : > { %p812_p12 = pneg %p811_p10 }
 0x160   : > { %960 = dma.done.wait (%p812_p12), %s548_s22, 4096  }
 0x161   : > { %962 = vsyncadd (%p812_p12), %s548_s22, 4294963200  ;;  %p17_p13 = scmp.ge.s32.totalorder %s1060_s24, 4   ;;  %s1321_s12 = smov %s969_s13 }
 0x162   : > { %s1322_s13 = smov %s973_s14  ;;  %s1323_s14 = smov %s1080_s5 }
 0x163   : > { %s1324_s15 = smov %s1060_s24  ;;  %19 = sbr.rel (!%p17_p13) target bundleno = 6 (0x6), region = 81 }
 0x168   :  { %553 = vsyncpa [#allocation3], 1 }
 0x169   :  { %555 = vsyncpa [#allocation3 + $0x1], 1 }
 0x16a   :  { %556 = vsyncpa [#allocation6], 1 }
 0x16b   :  { %557 = vsyncpa [#allocation4], 1 }
 0x16c   :  { %559 = vsyncpa [#allocation4 + $0x1], 1 }

</bundles_post_ra>
